<compile_context>
chip_gen: v5e
topology: v5e:2x2
jax: 0.10.0
libtpu: 0.0.40
codegen_flags: <defaults>
</compile_context>

<pallas_src>
import jax
import jax.numpy as jnp
from jax import lax
from jax.experimental import pallas as pl
from jax.experimental.pallas import tpu as pltpu

EPS = 1e-5  # torch GroupNorm default


def _resblock_kernel(x_ref, band1_ref, band2_ref, gmat_ref, gnb_ref,
                     o_ref, hpad_ref):
    H = x_ref.shape[1]
    WC = x_ref.shape[2]

    x = x_ref[0].astype(jnp.float32)          # (H, W*C) lane-dense image
    gmat = gmat_ref[...]                      # (W*C, W*C) group-avg operator

    # Zero the row-padded scratch once; only the two halo rows actually need
    # to be zero, the interior is overwritten by each conv.
    hpad_ref[...] = jnp.zeros_like(hpad_ref)

    def gn_relu(h, gidx):
        # gamma/beta already broadcast onto the lane layout: row 2*gidx is
        # gamma, row 2*gidx+1 is beta, each of shape (1, W*C).
        gamma = gnb_ref[pl.ds(2 * gidx, 1), :]
        beta = gnb_ref[pl.ds(2 * gidx + 1, 1), :]
        s1 = jnp.sum(h, axis=0, keepdims=True)                    # (1, W*C)
        mu = jnp.dot(s1, gmat, preferred_element_type=jnp.float32)  # group mean
        d = h - mu                                                  # centered
        s2 = jnp.sum(d * d, axis=0, keepdims=True)
        var = jnp.dot(s2, gmat, preferred_element_type=jnp.float32)  # group var
        inv = lax.rsqrt(var + EPS)
        y = d * (inv * gamma) + beta
        return jnp.maximum(y, 0.0)                                 # fused ReLU

    def conv3x3(h, band_ref):
        # Write interior rows; halo rows (0 and H+1) stay zero.
        hpad_ref[pl.ds(1, H), :] = h
        acc = jnp.dot(hpad_ref[pl.ds(0, H), :], band_ref[0],
                      preferred_element_type=jnp.float32)
        acc = acc + jnp.dot(hpad_ref[pl.ds(1, H), :], band_ref[1],
                            preferred_element_type=jnp.float32)
        acc = acc + jnp.dot(hpad_ref[pl.ds(2, H), :], band_ref[2],
                            preferred_element_type=jnp.float32)
        return acc                                                 # (H, W*C)

    h = gn_relu(x, 0)
    h = conv3x3(h, band1_ref)
    h = gn_relu(h, 1)
    h = conv3x3(h, band2_ref)
    o_ref[0] = (h + x).astype(o_ref.dtype)


def res_block(x_nchw, w1, w2, g1, b1, g2, b2, num_groups=8):
    """x_nchw: (N, C, H, W) float32. w*: (C_out, C_in, 3, 3) (PyTorch OIHW)."""
    N, C, H, W = x_nchw.shape
    assert C % num_groups == 0, "in_channels must be divisible by num_groups"
    gs = C // num_groups
    WC = W * C

    # NCHW -> (N, H, W*C): channels-last, W and C flattened onto the lane axis
    # (lane-dense when W*C is a multiple of 128; here W*C = 128 exactly).
    x = jnp.transpose(x_nchw, (0, 2, 3, 1)).reshape(N, H, WC)

    def band_matrices(w_oihw):
        # (C_out, C_in, 3, 3) -> (3, W*C, W*C) block-tridiagonal conv operators.
        # B_kh[(w+dx)*C + ci, w*C + co] = K[co, ci, kh, dx+1], dx in {-1,0,1},
        # entries with w+dx outside [0, W) are omitted (implements W padding).
        cols = jnp.arange(W)
        mats = []
        for kh in range(3):
            b4 = jnp.zeros((W, C, W, C), jnp.float32)
            for kw in range(3):
                dx = kw - 1
                blk = jnp.transpose(
                    w_oihw[:, :, kh, kw]).astype(jnp.float32)      # (C_in, C_out)
                shift = (cols[:, None] == (cols[None, :] + dx)).astype(jnp.float32)
                b4 = b4 + shift[:, None, :, None] * blk[None, :, None, :]
            mats.append(b4.reshape(WC, WC))
        return jnp.stack(mats, axis=0)

    band1 = band_matrices(w1)
    band2 = band_matrices(w2)

    # Group-averaging operator on the lane layout (lane l holds channel l % C);
    # assumes contiguous, equal-sized groups (true for nn.GroupNorm).
    grp = (jnp.arange(WC) % C) // gs
    gmat = (grp[:, None] == grp[None, :]).astype(jnp.float32) / float(H * W * gs)

    # gamma/beta broadcast onto the lane layout, stacked as (4, W*C).
    gnb = jnp.stack([jnp.tile(g1.astype(jnp.float32), W),
                     jnp.tile(b1.astype(jnp.float32), W),
                     jnp.tile(g2.astype(jnp.float32), W),
                     jnp.tile(b2.astype(jnp.float32), W)], axis=0)

    out = pl.pallas_call(
        _resblock_kernel,
        out_shape=jax.ShapeDtypeStruct((N, H, WC), x.dtype),
        grid_spec=pltpu.PrefetchScalarGridSpec(
            num_scalar_prefetch=0,
            grid=(N,),
            in_specs=[
                pl.BlockSpec((1, H, WC), lambda n: (n, 0, 0)),
                pl.BlockSpec((3, WC, WC), lambda n: (0, 0, 0)),
                pl.BlockSpec((3, WC, WC), lambda n: (0, 0, 0)),
                pl.BlockSpec((WC, WC), lambda n: (0, 0)),
                pl.BlockSpec((4, WC), lambda n: (0, 0)),
            ],
            out_specs=pl.BlockSpec((1, H, WC), lambda n: (n, 0, 0)),
            scratch_shapes=[pltpu.VMEM((H + 2, WC), jnp.float32)],
        ),
        compiler_params=pltpu.CompilerParams(
            dimension_semantics=("parallel",)),
    )(x, band1, band2, gmat, gnb)

    return jnp.transpose(out.reshape(N, H, W, C), (0, 3, 1, 2))   # -> NCHW


def _ref_forward(x, w1, w2, g1, b1, g2, b2, num_groups=8):
    """Pure-JAX reference of the PyTorch ResBlock forward (NCHW)."""
    def gn(h, gamma, beta):
        N, C, H, W = h.shape
        hg = h.reshape(N, num_groups, (C // num_groups) * H * W)
        mu = hg.mean(-1, keepdims=True)
        var = hg.var(-1, keepdims=True)
        hn = ((hg - mu) / jnp.sqrt(var + EPS)).reshape(N, C, H, W)
        return hn * gamma[None, :, None, None] + beta[None, :, None, None]

    def conv(h, w):
        return lax.conv_general_dilated(
            h, w, (1, 1), "SAME", dimension_numbers=("NCHW", "OIHW", "NCHW"))

    h = jax.nn.relu(gn(x, g1, b1))
    h = conv(h, w1)
    h = jax.nn.relu(gn(h, g2, b2))
    h = conv(h, w2)
    return h + x


if __name__ == "__main__":
    # spatial_dims=2, in_channels=8, kernel_size=3, norm_name='group', num_groups=8
    N, C, H, W = 2, 8, 16, 16
    key = jax.random.PRNGKey(0)
    kx, kw1, kw2 = jax.random.split(key, 3)

    x = jax.random.normal(kx, (N, C, H, W), dtype=jnp.float32)
    # Conv weights (no bias, as in get_conv_layer).
    w1 = 0.1 * jax.random.normal(kw1, (C, C, 3, 3), dtype=jnp.float32)
    w2 = 0.1 * jax.random.normal(kw2, (C, C, 3, 3), dtype=jnp.float32)
    # GroupNorm affine params as initialized by get_norm_layer: weight=1, bias=0.
    g1 = jnp.ones((C,), jnp.float32)
    b1 = jnp.zeros((C,), jnp.float32)
    g2 = jnp.ones((C,), jnp.float32)
    b2 = jnp.zeros((C,), jnp.float32)

    out = res_block(x, w1, w2, g1, b1, g2, b2, num_groups=8)
    out = jax.block_until_ready(out)

    ref = _ref_forward(x, w1, w2, g1, b1, g2, b2, num_groups=8)
    assert out.shape == (N, C, H, W)
    assert jnp.allclose(out, ref, rtol=1e-4, atol=1e-4), (
        float(jnp.max(jnp.abs(out - ref))))

    print("KERNEL_OK")
</pallas_src>

<mosaic_0001>
module attributes {stable_mosaic.version = 11 : i64} {
  func.func @_resblock_kernel(%arg0: i32, %arg1: memref<1x16x128xf32, #tpu.memory_space<vmem>>, %arg2: memref<3x128x128xf32, #tpu.memory_space<vmem>>, %arg3: memref<3x128x128xf32, #tpu.memory_space<vmem>>, %arg4: memref<128x128xf32, #tpu.memory_space<vmem>>, %arg5: memref<4x128xf32, #tpu.memory_space<vmem>>, %arg6: memref<1x16x128xf32, #tpu.memory_space<vmem>>, %arg7: memref<18x128xf32, #tpu.memory_space<vmem>>) attributes {dimension_semantics = [#tpu.dimension_semantics<parallel>], iteration_bounds = array<i64: 2>, scalar_prefetch = 0 : i64, scratch_operands = 1 : i64, tpu.core_type = #tpu.core_type<tc>, window_params = [{transform_indices = @transform_0, window_bounds = array<i64: 1, 16, 128>}, {pipeline_mode = #tpu.pipeline_mode<synchronous>, transform_indices = @transform_1, window_bounds = array<i64: 3, 128, 128>}, {pipeline_mode = #tpu.pipeline_mode<synchronous>, transform_indices = @transform_2, window_bounds = array<i64: 3, 128, 128>}, {pipeline_mode = #tpu.pipeline_mode<synchronous>, transform_indices = @transform_3, window_bounds = array<i64: 128, 128>}, {pipeline_mode = #tpu.pipeline_mode<synchronous>, transform_indices = @transform_4, window_bounds = array<i64: 4, 128>}, {transform_indices = @transform_5, window_bounds = array<i64: 1, 16, 128>}]} {
    %c0 = arith.constant 0 : index
    %c0_0 = arith.constant 0 : index
    %c0_1 = arith.constant 0 : index
    %0 = vector.load %arg1[%c0, %c0_0, %c0_1] : memref<1x16x128xf32, #tpu.memory_space<vmem>>, vector<1x16x128xf32>
    %1 = vector.shape_cast %0 : vector<1x16x128xf32> to vector<16x128xf32>
    %c0_2 = arith.constant 0 : index
    %c0_3 = arith.constant 0 : index
    %2 = vector.load %arg4[%c0_2, %c0_3] : memref<128x128xf32, #tpu.memory_space<vmem>>, vector<128x128xf32>
    %cst = arith.constant 0.000000e+00 : f32
    %3 = vector.broadcast %cst : f32 to vector<18x128xf32>
    %c0_4 = arith.constant 0 : index
    %c0_5 = arith.constant 0 : index
    %4 = vector.load %arg7[%c0_4, %c0_5] : memref<18x128xf32, #tpu.memory_space<vmem>>, vector<18x128xf32>
    tpu.vector_store %arg7[%c0_4, %c0_5], %3 {strides = array<i32>} : memref<18x128xf32, #tpu.memory_space<vmem>>, vector<18x128xf32>,
    %c0_6 = arith.constant 0 : index
    %c0_7 = arith.constant 0 : index
    %5 = vector.load %arg5[%c0_6, %c0_7] : memref<4x128xf32, #tpu.memory_space<vmem>>, vector<1x128xf32>
    %c1 = arith.constant 1 : index
    %c0_8 = arith.constant 0 : index
    %6 = vector.load %arg5[%c1, %c0_8] : memref<4x128xf32, #tpu.memory_space<vmem>>, vector<1x128xf32>
    %cst_9 = arith.constant dense<0.000000e+00> : vector<128xf32>
    %7 = vector.multi_reduction <add>, %1, %cst_9 [0] : vector<16x128xf32> to vector<128xf32>
    %8 = vector.shape_cast %7 : vector<128xf32> to vector<1x128xf32>
    %cst_10 = arith.constant dense<0.000000e+00> : vector<1x128xf32>
    %9 = tpu.matmul %8, %2, %cst_10 {dimension_numbers = #tpu.dot_dimension_numbers<[1], [0], [0], [1], [0, 0, 1, 1], [], []>} : vector<1x128xf32>, vector<128x128xf32>, vector<1x128xf32> -> vector<1x128xf32>
    %10 = vector.broadcast %9 : vector<1x128xf32> to vector<16x128xf32>
    %11 = arith.subf %1, %10 : vector<16x128xf32>
    %12 = arith.mulf %11, %11 : vector<16x128xf32>
    %cst_11 = arith.constant dense<0.000000e+00> : vector<128xf32>
    %13 = vector.multi_reduction <add>, %12, %cst_11 [0] : vector<16x128xf32> to vector<128xf32>
    %14 = vector.shape_cast %13 : vector<128xf32> to vector<1x128xf32>
    %cst_12 = arith.constant dense<0.000000e+00> : vector<1x128xf32>
    %15 = tpu.matmul %14, %2, %cst_12 {dimension_numbers = #tpu.dot_dimension_numbers<[1], [0], [0], [1], [0, 0, 1, 1], [], []>} : vector<1x128xf32>, vector<128x128xf32>, vector<1x128xf32> -> vector<1x128xf32>
    %cst_13 = arith.constant 9.99999974E-6 : f32
    %16 = vector.broadcast %cst_13 : f32 to vector<1x128xf32>
    %17 = arith.addf %15, %16 : vector<1x128xf32>
    %18 = math.rsqrt %17 : vector<1x128xf32>
    %19 = arith.mulf %18, %5 : vector<1x128xf32>
    %20 = vector.broadcast %19 : vector<1x128xf32> to vector<16x128xf32>
    %21 = arith.mulf %11, %20 : vector<16x128xf32>
    %22 = vector.broadcast %6 : vector<1x128xf32> to vector<16x128xf32>
    %23 = arith.addf %21, %22 : vector<16x128xf32>
    %cst_14 = arith.constant 0.000000e+00 : f32
    %24 = vector.broadcast %cst_14 : f32 to vector<16x128xf32>
    %25 = arith.maximumf %23, %24 : vector<16x128xf32>
    %c1_15 = arith.constant 1 : index
    %c0_16 = arith.constant 0 : index
    %26 = vector.load %arg7[%c1_15, %c0_16] : memref<18x128xf32, #tpu.memory_space<vmem>>, vector<16x128xf32>
    tpu.vector_store %arg7[%c1_15, %c0_16], %25 {strides = array<i32>} : memref<18x128xf32, #tpu.memory_space<vmem>>, vector<16x128xf32>,
    %c0_17 = arith.constant 0 : index
    %c0_18 = arith.constant 0 : index
    %27 = vector.load %arg7[%c0_17, %c0_18] : memref<18x128xf32, #tpu.memory_space<vmem>>, vector<16x128xf32>
    %c0_19 = arith.constant 0 : index
    %c0_20 = arith.constant 0 : index
    %c0_21 = arith.constant 0 : index
    %28 = vector.load %arg2[%c0_19, %c0_20, %c0_21] : memref<3x128x128xf32, #tpu.memory_space<vmem>>, vector<1x128x128xf32>
    %29 = vector.shape_cast %28 : vector<1x128x128xf32> to vector<128x128xf32>
    %cst_22 = arith.constant dense<0.000000e+00> : vector<16x128xf32>
    %30 = tpu.matmul %27, %29, %cst_22 {dimension_numbers = #tpu.dot_dimension_numbers<[1], [0], [0], [1], [0, 0, 1, 1], [], []>} : vector<16x128xf32>, vector<128x128xf32>, vector<16x128xf32> -> vector<16x128xf32>
    %c1_23 = arith.constant 1 : index
    %c0_24 = arith.constant 0 : index
    %31 = vector.load %arg7[%c1_23, %c0_24] : memref<18x128xf32, #tpu.memory_space<vmem>>, vector<16x128xf32>
    %c1_25 = arith.constant 1 : index
    %c0_26 = arith.constant 0 : index
    %c0_27 = arith.constant 0 : index
    %32 = vector.load %arg2[%c1_25, %c0_26, %c0_27] : memref<3x128x128xf32, #tpu.memory_space<vmem>>, vector<1x128x128xf32>
    %33 = vector.shape_cast %32 : vector<1x128x128xf32> to vector<128x128xf32>
    %cst_28 = arith.constant dense<0.000000e+00> : vector<16x128xf32>
    %34 = tpu.matmul %31, %33, %cst_28 {dimension_numbers = #tpu.dot_dimension_numbers<[1], [0], [0], [1], [0, 0, 1, 1], [], []>} : vector<16x128xf32>, vector<128x128xf32>, vector<16x128xf32> -> vector<16x128xf32>
    %35 = arith.addf %30, %34 : vector<16x128xf32>
    %c2 = arith.constant 2 : index
    %c0_29 = arith.constant 0 : index
    %36 = vector.load %arg7[%c2, %c0_29] : memref<18x128xf32, #tpu.memory_space<vmem>>, vector<16x128xf32>
    %c2_30 = arith.constant 2 : index
    %c0_31 = arith.constant 0 : index
    %c0_32 = arith.constant 0 : index
    %37 = vector.load %arg2[%c2_30, %c0_31, %c0_32] : memref<3x128x128xf32, #tpu.memory_space<vmem>>, vector<1x128x128xf32>
    %38 = vector.shape_cast %37 : vector<1x128x128xf32> to vector<128x128xf32>
    %cst_33 = arith.constant dense<0.000000e+00> : vector<16x128xf32>
    %39 = tpu.matmul %36, %38, %cst_33 {dimension_numbers = #tpu.dot_dimension_numbers<[1], [0], [0], [1], [0, 0, 1, 1], [], []>} : vector<16x128xf32>, vector<128x128xf32>, vector<16x128xf32> -> vector<16x128xf32>
    %40 = arith.addf %35, %39 : vector<16x128xf32>
    %c2_34 = arith.constant 2 : index
    %c0_35 = arith.constant 0 : index
    %41 = vector.load %arg5[%c2_34, %c0_35] : memref<4x128xf32, #tpu.memory_space<vmem>>, vector<1x128xf32>
    %c3 = arith.constant 3 : index
    %c0_36 = arith.constant 0 : index
    %42 = vector.load %arg5[%c3, %c0_36] : memref<4x128xf32, #tpu.memory_space<vmem>>, vector<1x128xf32>
    %cst_37 = arith.constant dense<0.000000e+00> : vector<128xf32>
    %43 = vector.multi_reduction <add>, %40, %cst_37 [0] : vector<16x128xf32> to vector<128xf32>
    %44 = vector.shape_cast %43 : vector<128xf32> to vector<1x128xf32>
    %cst_38 = arith.constant dense<0.000000e+00> : vector<1x128xf32>
    %45 = tpu.matmul %44, %2, %cst_38 {dimension_numbers = #tpu.dot_dimension_numbers<[1], [0], [0], [1], [0, 0, 1, 1], [], []>} : vector<1x128xf32>, vector<128x128xf32>, vector<1x128xf32> -> vector<1x128xf32>
    %46 = vector.broadcast %45 : vector<1x128xf32> to vector<16x128xf32>
    %47 = arith.subf %40, %46 : vector<16x128xf32>
    %48 = arith.mulf %47, %47 : vector<16x128xf32>
    %cst_39 = arith.constant dense<0.000000e+00> : vector<128xf32>
    %49 = vector.multi_reduction <add>, %48, %cst_39 [0] : vector<16x128xf32> to vector<128xf32>
    %50 = vector.shape_cast %49 : vector<128xf32> to vector<1x128xf32>
    %cst_40 = arith.constant dense<0.000000e+00> : vector<1x128xf32>
    %51 = tpu.matmul %50, %2, %cst_40 {dimension_numbers = #tpu.dot_dimension_numbers<[1], [0], [0], [1], [0, 0, 1, 1], [], []>} : vector<1x128xf32>, vector<128x128xf32>, vector<1x128xf32> -> vector<1x128xf32>
    %cst_41 = arith.constant 9.99999974E-6 : f32
    %52 = vector.broadcast %cst_41 : f32 to vector<1x128xf32>
    %53 = arith.addf %51, %52 : vector<1x128xf32>
    %54 = math.rsqrt %53 : vector<1x128xf32>
    %55 = arith.mulf %54, %41 : vector<1x128xf32>
    %56 = vector.broadcast %55 : vector<1x128xf32> to vector<16x128xf32>
    %57 = arith.mulf %47, %56 : vector<16x128xf32>
    %58 = vector.broadcast %42 : vector<1x128xf32> to vector<16x128xf32>
    %59 = arith.addf %57, %58 : vector<16x128xf32>
    %cst_42 = arith.constant 0.000000e+00 : f32
    %60 = vector.broadcast %cst_42 : f32 to vector<16x128xf32>
    %61 = arith.maximumf %59, %60 : vector<16x128xf32>
    %c1_43 = arith.constant 1 : index
    %c0_44 = arith.constant 0 : index
    %62 = vector.load %arg7[%c1_43, %c0_44] : memref<18x128xf32, #tpu.memory_space<vmem>>, vector<16x128xf32>
    tpu.vector_store %arg7[%c1_43, %c0_44], %61 {strides = array<i32>} : memref<18x128xf32, #tpu.memory_space<vmem>>, vector<16x128xf32>,
    %c0_45 = arith.constant 0 : index
    %c0_46 = arith.constant 0 : index
    %63 = vector.load %arg7[%c0_45, %c0_46] : memref<18x128xf32, #tpu.memory_space<vmem>>, vector<16x128xf32>
    %c0_47 = arith.constant 0 : index
    %c0_48 = arith.constant 0 : index
    %c0_49 = arith.constant 0 : index
    %64 = vector.load %arg3[%c0_47, %c0_48, %c0_49] : memref<3x128x128xf32, #tpu.memory_space<vmem>>, vector<1x128x128xf32>
    %65 = vector.shape_cast %64 : vector<1x128x128xf32> to vector<128x128xf32>
    %cst_50 = arith.constant dense<0.000000e+00> : vector<16x128xf32>
    %66 = tpu.matmul %63, %65, %cst_50 {dimension_numbers = #tpu.dot_dimension_numbers<[1], [0], [0], [1], [0, 0, 1, 1], [], []>} : vector<16x128xf32>, vector<128x128xf32>, vector<16x128xf32> -> vector<16x128xf32>
    %c1_51 = arith.constant 1 : index
    %c0_52 = arith.constant 0 : index
    %67 = vector.load %arg7[%c1_51, %c0_52] : memref<18x128xf32, #tpu.memory_space<vmem>>, vector<16x128xf32>
    %c1_53 = arith.constant 1 : index
    %c0_54 = arith.constant 0 : index
    %c0_55 = arith.constant 0 : index
    %68 = vector.load %arg3[%c1_53, %c0_54, %c0_55] : memref<3x128x128xf32, #tpu.memory_space<vmem>>, vector<1x128x128xf32>
    %69 = vector.shape_cast %68 : vector<1x128x128xf32> to vector<128x128xf32>
    %cst_56 = arith.constant dense<0.000000e+00> : vector<16x128xf32>
    %70 = tpu.matmul %67, %69, %cst_56 {dimension_numbers = #tpu.dot_dimension_numbers<[1], [0], [0], [1], [0, 0, 1, 1], [], []>} : vector<16x128xf32>, vector<128x128xf32>, vector<16x128xf32> -> vector<16x128xf32>
    %71 = arith.addf %66, %70 : vector<16x128xf32>
    %c2_57 = arith.constant 2 : index
    %c0_58 = arith.constant 0 : index
    %72 = vector.load %arg7[%c2_57, %c0_58] : memref<18x128xf32, #tpu.memory_space<vmem>>, vector<16x128xf32>
    %c2_59 = arith.constant 2 : index
    %c0_60 = arith.constant 0 : index
    %c0_61 = arith.constant 0 : index
    %73 = vector.load %arg3[%c2_59, %c0_60, %c0_61] : memref<3x128x128xf32, #tpu.memory_space<vmem>>, vector<1x128x128xf32>
    %74 = vector.shape_cast %73 : vector<1x128x128xf32> to vector<128x128xf32>
    %cst_62 = arith.constant dense<0.000000e+00> : vector<16x128xf32>
    %75 = tpu.matmul %72, %74, %cst_62 {dimension_numbers = #tpu.dot_dimension_numbers<[1], [0], [0], [1], [0, 0, 1, 1], [], []>} : vector<16x128xf32>, vector<128x128xf32>, vector<16x128xf32> -> vector<16x128xf32>
    %76 = arith.addf %71, %75 : vector<16x128xf32>
    %77 = arith.addf %76, %1 : vector<16x128xf32>
    %c0_63 = arith.constant 0 : index
    %c0_64 = arith.constant 0 : index
    %c0_65 = arith.constant 0 : index
    %78 = vector.load %arg6[%c0_63, %c0_64, %c0_65] : memref<1x16x128xf32, #tpu.memory_space<vmem>>, vector<1x16x128xf32>
    %79 = vector.shape_cast %78 : vector<1x16x128xf32> to vector<16x128xf32>
    %80 = vector.shape_cast %77 : vector<16x128xf32> to vector<1x16x128xf32>
    tpu.vector_store %arg6[%c0_63, %c0_64, %c0_65], %80 {strides = array<i32>} : memref<1x16x128xf32, #tpu.memory_space<vmem>>, vector<1x16x128xf32>,
    return
  }
  func.func @transform_0(%arg0: i32) -> (i32, i32, i32) {
    %c0_i32 = arith.constant 0 : i32
    %c0_i32_0 = arith.constant 0 : i32
    %c0_i32_1 = arith.constant 0 : i32
    return %arg0, %c0_i32, %c0_i32_0 : i32, i32, i32
  }
  func.func @transform_1(%arg0: i32) -> (i32, i32, i32) {
    %c0_i32 = arith.constant 0 : i32
    %c0_i32_0 = arith.constant 0 : i32
    %c0_i32_1 = arith.constant 0 : i32
    %c0_i32_2 = arith.constant 0 : i32
    return %c0_i32, %c0_i32_0, %c0_i32_1 : i32, i32, i32
  }
  func.func @transform_2(%arg0: i32) -> (i32, i32, i32) {
    %c0_i32 = arith.constant 0 : i32
    %c0_i32_0 = arith.constant 0 : i32
    %c0_i32_1 = arith.constant 0 : i32
    %c0_i32_2 = arith.constant 0 : i32
    return %c0_i32, %c0_i32_0, %c0_i32_1 : i32, i32, i32
  }
  func.func @transform_3(%arg0: i32) -> (i32, i32) {
    %c0_i32 = arith.constant 0 : i32
    %c0_i32_0 = arith.constant 0 : i32
    %c0_i32_1 = arith.constant 0 : i32
    return %c0_i32, %c0_i32_0 : i32, i32
  }
  func.func @transform_4(%arg0: i32) -> (i32, i32) {
    %c0_i32 = arith.constant 0 : i32
    %c0_i32_0 = arith.constant 0 : i32
    %c0_i32_1 = arith.constant 0 : i32
    return %c0_i32, %c0_i32_0 : i32, i32
  }
  func.func @transform_5(%arg0: i32) -> (i32, i32, i32) {
    %c0_i32 = arith.constant 0 : i32
    %c0_i32_0 = arith.constant 0 : i32
    %c0_i32_1 = arith.constant 0 : i32
    return %arg0, %c0_i32, %c0_i32_0 : i32, i32, i32
  }
}

</mosaic_0001>

<bundles_post_ra>
// kernel: tpu_custom_call.1
= control target key start
LH: loop header
LB: loop body
LE: loop exit
PB: predicated region body
PF: predicated region fallthrough
CT: control target
= control target key end

     0   :  { %10 = vsyncpa [#allocation4], 0  ;;  %s1587_s0 = inlined_call_operand.hbm [shape: f32[2,16,128], index: 0, kind: input, shape index: {}]   ;;  %s1588_s1 = inlined_call_operand.hbm [shape: f32[3,128,128], index: 1, kind: input, shape index: {}]   ;;  %s1589_s2 = inlined_call_operand.hbm [shape: f32[3,128,128], index: 2, kind: input, shape index: {}]   ;;  %s1590_s3 = inlined_call_operand.hbm [shape: f32[128,128], index: 3, kind: input, shape index: {}]   ;;  %s1591_s4 = inlined_call_operand.hbm [shape: f32[4,128], index: 4, kind: input, shape index: {}]   ;;  %s1592_s5 = inlined_call_operand.hbm [shape: f32[2,16,128], index: 5, kind: output, shape index: {}]  }
   0x1   :  { %12 = vsyncpa [#allocation4 + $0x1], 0 }
   0x2   :  { %13 = vsyncpa [#allocation7], 0 }
   0x3   :  { %14 = vsyncpa [#allocation10], 0 }
   0x4   :  { %15 = vsyncpa [#allocation5], 0 }
   0x5   :  { %17 = vsyncpa [#allocation5 + $0x1], 0  ;;  %s1282_s18 = smov 0   ;;  %s1284_s19 = smov 0  }
   0x6   :  { %s1286_s20 = smov 0   ;;  %s1288_s21 = smov 0  }
   0x7 LB: > { %s1303_s22 = sadd.s32 4294967295, %s1241_s21   ;;  %s879_s23 = sadd.s32 4294967294, %s1241_s21   ;;  %s1241_s21 = sphi %s1288_s21, %s1605_s21   ;;  %s1237_s20 = sphi %s1286_s20, %s1604_s20   ;;  %s1233_s19 = sphi %s1284_s19, %s1603_s19   ;;  %s1229_s18 = sphi %s1282_s18, %s1602_s18  }
   0x8   : > { %p43_p0 = scmp.ne.s32.totalorder %s1233_s19, %s1229_s18  ;;  %p44_p1 = scmp.eq.s32.totalorder %s1303_s22, 0 }
   0x9   : > { %p151_p2 = scmp.eq.s32.totalorder %s1303_s22, 1  ;;  %p157_p3 = scmp.eq.s32.totalorder %s879_s23, 1 }
   0xa   : > { %p1312_p4 = por %p44_p1, %p43_p0  ;;  %p880_p5 = scmp.ge.s32.totalorder %s1241_s21, 1 }
   0xb   : > { %p1317_p6 = por %p157_p3, %p43_p0  ;;  %p164_p7 = scmp.lt.s32.totalorder %s1241_s21, 3 }
   0xc   : > { %s175_s28 = sshll.u32 %s1588_s1, 4  ;;  %s1243_s30 = smov [#allocation6]   ;;  %s176_s28 = int_to_ptr.hbm [resolvable:$true] %s175_s28 }
   0xd   : > { %p1325_p8 = pnand %p880_p5, %p164_p7  ;;  %s177_s6 = sshll.u32 %s1243_s30, 4  ;;  %s178_s6 = int_to_ptr.vmem [resolvable:$true] %s177_s6 }
   0xe   : > { %s203_s10 = sshll.u32 %s1590_s3, 4  ;;  %s1593_s11 = smov 128   ;;  %s204_s10 = int_to_ptr.hbm [resolvable:$true] %s203_s10 }
   0xf   : > { %p939_p9 = pneg %p1325_p8  ;;  %s1245_s12 = smov 8  }
  0x10   : > { %s1246_s13 = smov [#allocation9]   ;;  %s189_s17 = sshll.u32 %s1589_s2, 4  ;;  %s190_s17 = int_to_ptr.hbm [resolvable:$true] %s189_s17 }
  0x11   : > { %p1333_p10 = pnand %p939_p9, %p44_p1  ;;  %s205_s14 = sshll.u32 %s1246_s13, 4  ;;  %s206_s14 = int_to_ptr.vmem [resolvable:$true] %s205_s14 }
  0x12   : > { %s218_s27 = sshll.u32 %s1591_s4, 4  ;;  %s1365_s9 = sadd.s32 1, %s1241_s21   ;;  %s219_s27 = int_to_ptr.hbm [resolvable:$true] %s218_s27 }
  0x13   : > { %942 = dma.hbm_to_vmem [thread:$0]  (!%p1333_p10), %s176_s28, 6144, %s178_s6, [#allocation7], %s1593_s11, %s1593_s11, %s1245_s12  }
  0x14   : > { %948 = dma.hbm_to_vmem [thread:$0]  (!%p1333_p10), %s204_s10, 2048, %s206_s14, [#allocation10], %s1593_s11, %s1593_s11, %s1245_s12  }
  0x15   : > { %s1247_s28 = smov [#allocation8]   ;;  %s1248_s6 = smov [#allocation11]  }
  0x16   : > { %s191_s30 = sshll.u32 %s1247_s28, 4  ;;  %s220_s8 = sshll.u32 %s1248_s6, 4  ;;  %s192_s30 = int_to_ptr.vmem [resolvable:$true] %s191_s30  ;;  %s221_s8 = int_to_ptr.vmem [resolvable:$true] %s220_s8 }
  0x17   : > { %945 = dma.hbm_to_vmem [thread:$0]  (!%p1333_p10), %s190_s17, 6144, %s192_s30, [#allocation7], %s1593_s11, %s1593_s11, %s1245_s12  }
  0x18   : > { %951 = dma.hbm_to_vmem [thread:$0]  (!%p1333_p10), %s219_s27, 64, %s221_s8, [#allocation10]  }
  0x19   : > { %s30_s10 = sadd.s32 1, %s1237_s20  ;;  %s27_s13 = ssub.s32 %s1241_s21, %s1365_s9 }
  0x1a   : > { %p37_p12 = scmp.ne.s32.totalorder %s1237_s20, %s1233_s19  ;;  %p28_p13 = scmp.eq.s32.totalorder %s27_s13, 0 }
  0x1b   : > { %p38_p0 = scmp.eq.s32.totalorder %s1241_s21, 0  ;;  %p964_p5 = scmp.lt.s32.totalorder %s1241_s21, 2 }
  0x1c   : > { %p1375_p3 = por %p151_p2, %p37_p12  ;;  %s231_s16 = sand.u32 1, %s1237_s20  }
  0x1d   : > { %s1381_s15 = scalar_select %p28_p13, %s1237_s20, %s30_s10  }
  0x1e   : > { %p39_p7 = por %p38_p0, %p37_p12  ;;  %s886_s7 = sshll.u32 %s231_s16, 4 }
  0x1f   : > { %s901_s17 = sshll.u32 %s1241_s21, 4  ;;  %s235_s28 = scalar_lea.vmem [#allocation3], %s886_s7 }
  0x20   : > { %s240_s27 = scalar_lea.hbm %s1587_s0, %s901_s17  ;;  %s243_s30 = sshll.u32 %s235_s28, 4  ;;  %s244_s30 = int_to_ptr.vmem [resolvable:$true] %s243_s30 }
  0x21   : > { %s241_s6 = sshll.u32 %s240_s27, 4  ;;  %p1388_p2 = pnand %p964_p5, %p39_p7  ;;  %s242_s6 = int_to_ptr.hbm [resolvable:$true] %s241_s6 }
  0x22   : > { %s232_s10 = scalar_lea.sflag [#allocation4], %s231_s16  ;;  %s1137_s13 = sshra.s32 %s242_s6, 4  ;;  %s1138_s13 = int_to_ptr.hbm [resolvable:$true] %s1137_s13 }
  0x23   : > { %s1139_s11 = scalar_lea.hbm %s1138_s13, 16  ;;  %p1141_p10 = pneg %p1388_p2 }
  0x24   : > { %p1140_p9 = scmp.ne.s32.totalorder %s1138_s13, %s1139_s11  ;;  %s1144_s23 = scalar_lea.hbm %s1587_s0, 32 }
  0x25   : > { %p1145_p0 = scmp.lt.s32.totalorder %s1138_s13, %s1587_s0  ;;  %p1146_p5 = scmp.lt.s32.totalorder %s1144_s23, %s1139_s11 }
  0x26   : > { %p1142_p12 = pnand %p1141_p10, %p1140_p9 }
  0x27   : > { %p1147_p7 = por %p1146_p5, %p1145_p0 }
  0x28   : > { %p1143_p13 = pneg %p1142_p12 }
  0x2a   : > { %p1148_p11 = pnand %p1147_p7, %p1143_p13 }
  0x2c   : > { %1151 = shalt.err (!%p1148_p11)
}
  0x2d   : > { %s1600_s16 = smov 128   ;;  %255 = sbr.rel (%p1325_p8) target bundleno = 1027 (0x403), region = 40 }
  0x2e   : > { %955 = dma.hbm_to_vmem [thread:$0]  (!%p1388_p2), %s242_s6, 256, %s244_s30, %s232_s10, %s1600_s16, %s1600_s16, %s1245_s12  }
  0x2f   : > { %s1408_s28 = sand.u32 (!%p1325_p8), 1, %s1233_s19  }
  0x30   : > { %s890_s11 = sshll.u32 (!%p1325_p8), %s1408_s28, 4  ;;  %s258_s13 = scalar_lea.sflag (!%p1325_p8), [#allocation4], %s1408_s28 }
  0x31   : > { %s261_s17 = scalar_lea.vmem (!%p1325_p8), [#allocation3], %s890_s11 }
  0x32   : > { %1212 = dma.done.wait (%p1312_p4), %s258_s13, 256  }
  0x33   : > { %1214 = vsyncadd (%p1312_p4), %s258_s13, 4294967040 }
  0x34   : > { %1216 = dma.done.wait (%p44_p1), [#allocation7], 12288  }
  0x35   : > { %1218 = vsyncadd (%p44_p1), [#allocation7], 4294955008 }
  0x36   : > { %1220 = dma.done.wait (%p44_p1), [#allocation10], 2112  }
  0x37   : > { %1222 = vsyncadd (%p44_p1), [#allocation10], 4294965184  ;;  %v1426_v0 = vld [vmem:[#allocation9 + $0x78] sm:$0xff]  ;;  %v1428_v1 = vld [vmem:[#allocation9 + $0x70] sm:$0xff]  ;;  %v1249_v25 = vmov 0.0   ;;  %s902_s24 = sshll.u32 %s1303_s22, 4 }
  0x38   : > { %339 = vmatpush.msra.mxu2 %v1426_v0  ;;  %371 = vmatpush.msra.mxu1 %v1426_v0  ;;  %v1432_v2 = vld [vmem:[#allocation9 + $0x68] sm:$0xff]  ;;  %v1436_v3 = vld [vmem:[#allocation9 + $0x60] sm:$0xff]  ;;  %v1444_v6 = vld [vmem:[#allocation9 + $0x58] sm:$0xff]  ;;  %327 = vst [vmem:[#allocation2] sm:$0xff] %v1249_v25  ;;  %s764_s30 = scalar_lea.hbm %s1592_s5, %s902_s24  ;;  %s308_s6 = scalar_lea.vmem [#allocation12], %s890_s11 }
  0x39   : > { %v1439_v4 = vld [vmem:[%s261_s17] sm:$0xff]  ;;  %v1441_v5 = vld [vmem:[%s261_s17 + $0x8] sm:$0xff]  ;;  %328 = vst [vmem:[#allocation2 + $0x8] sm:$0xff] %v1249_v25  ;;  %s765_s8 = sshll.u32 %s308_s6, 4  ;;  %s767_s10 = sshll.u32 %s764_s30, 4  ;;  %s766_s8 = int_to_ptr.vmem [resolvable:$true] %s765_s8  ;;  %s768_s10 = int_to_ptr.hbm [resolvable:$true] %s767_s10 }
  0x3a   : > { %340 = vmatpush.msra.mxu2 %v1428_v1  ;;  %372 = vmatpush.msra.mxu1 %v1428_v1  ;;  %v332_v7 = vadd.f32 %v1441_v5, %v1439_v4  ;;  %v1450_v8 = vld [vmem:[#allocation9 + $0x50] sm:$0xff]  ;;  %v1454_v10 = vld [vmem:[#allocation9 + $0x48] sm:$0xff]  ;;  %v1458_v11 = vld [vmem:[#allocation9 + $0x40] sm:$0xff]  ;;  %329 = vst [vmem:[#allocation2 + $0x10] sm:$0x3] %v1249_v25  ;;  %s753_s22 = scalar_lea.sflag [#allocation5], %s1408_s28 }
  0x3b   : > { %v1462_v13 = vld [vmem:[#allocation9 + $0x38] sm:$0xff]  ;;  %v1466_v14 = vld [vmem:[#allocation9 + $0x30] sm:$0xff]  ;;  %v1470_v16 = vld [vmem:[#allocation9 + $0x28] sm:$0xff]  ;;  %s1181_s7 = sshra.s32 %s768_s10, 4  ;;  %s1187_s16 = scalar_lea.hbm %s1592_s5, 32  ;;  %s1182_s7 = int_to_ptr.hbm [resolvable:$true] %s1181_s7 }
  0x3c   : > { %341 = vmatpush.msra.mxu2 %v1432_v2  ;;  %373 = vmatpush.msra.mxu1 %v1432_v2  ;;  %v333_v9 = vrot.slane %v332_v7, 4  ;;  %v1474_v17 = vld [vmem:[#allocation9 + $0x20] sm:$0xff]  ;;  %v1478_v19 = vld [vmem:[#allocation9 + $0x18] sm:$0xff]  ;;  %v1482_v20 = vld [vmem:[#allocation9 + $0x10] sm:$0xff]  ;;  %s1183_s23 = scalar_lea.hbm %s1182_s7, 16  ;;  %p1188_p11 = scmp.lt.s32.totalorder %s1182_s7, %s1592_s5 }
  0x3d   : > { %v1486_v22 = vld [vmem:[#allocation9 + $0x8] sm:$0xff]  ;;  %v1490_v23 = vld [vmem:[#allocation9] sm:$0xff]  ;;  %v448_v39 = vld [vmem:[#allocation6 + $0xf8] sm:$0xff]  ;;  %p1184_p1 = scmp.ne.s32.totalorder %s1182_s7, %s1183_s23  ;;  %p1189_p2 = scmp.lt.s32.totalorder %s1187_s16, %s1183_s23 }
  0x3e   : > { %342 = vmatpush.msra.mxu2 %v1436_v3  ;;  %374 = vmatpush.msra.mxu1 %v1436_v3  ;;  %v334_v12 = vadd.f32 %v333_v9, %v332_v7  ;;  %v447_v40 = vld [vmem:[#allocation6 + $0xf0] sm:$0xff]  ;;  %v446_v41 = vld [vmem:[#allocation6 + $0xe8] sm:$0xff]  ;;  %v445_v42 = vld [vmem:[#allocation6 + $0xe0] sm:$0xff] }
  0x3f   : > { %v429_v43 = vld [vmem:[#allocation6 + $0x78] sm:$0xff]  ;;  %v428_v46 = vld [vmem:[#allocation6 + $0x70] sm:$0xff]  ;;  %v427_v49 = vld [vmem:[#allocation6 + $0x68] sm:$0xff]  ;;  %p1185_p4 = pnand %p1184_p1, %p1375_p3  ;;  %p1190_p9 = por %p1189_p2, %p1188_p11 }
  0x40   : > { %343 = vmatpush.msra.mxu2 %v1444_v6  ;;  %375 = vmatpush.msra.mxu1 %v1444_v6  ;;  %v335_v15 = vrot.slane %v334_v12, 2  ;;  %v513_v44 = vld [vmem:[#allocation6 + $0x178] sm:$0xff]  ;;  %v512_v47 = vld [vmem:[#allocation6 + $0x170] sm:$0xff]  ;;  %v511_v50 = vld [vmem:[#allocation6 + $0x168] sm:$0xff] }
  0x41   : > { %v444_v45 = vld [vmem:[#allocation6 + $0xd8] sm:$0xff]  ;;  %472 = vmatpush.msra.mxu3 %v429_v43  ;;  %514 = vmatpush.msra.mxu0 %v513_v44  ;;  %v443_v48 = vld [vmem:[#allocation6 + $0xd0] sm:$0xff]  ;;  %v442_v51 = vld [vmem:[#allocation6 + $0xc8] sm:$0xff]  ;;  %p1186_p8 = pneg %p1185_p4 }
  0x42   : > { %344 = vmatpush.msra.mxu2 %v1450_v8  ;;  %376 = vmatpush.msra.mxu1 %v1450_v8  ;;  %v336_v18 = vadd.f32 %v335_v15, %v334_v12  ;;  %v426_v52 = vld [vmem:[#allocation6 + $0x60] sm:$0xff]  ;;  %v425_v55 = vld [vmem:[#allocation6 + $0x58] sm:$0xff]  ;;  %v424_v58 = vld [vmem:[#allocation6 + $0x50] sm:$0xff] }
  0x43   : > { %473 = vmatpush.msra.mxu3 %v428_v46  ;;  %515 = vmatpush.msra.mxu0 %v512_v47  ;;  %v510_v53 = vld [vmem:[#allocation6 + $0x160] sm:$0xff]  ;;  %v509_v56 = vld [vmem:[#allocation6 + $0x158] sm:$0xff]  ;;  %v508_v59 = vld [vmem:[#allocation6 + $0x150] sm:$0xff]  ;;  %p1191_p10 = pnand %p1190_p9, %p1186_p8 }
  0x44   : > { %345 = vmatpush.msra.mxu2 %v1454_v10  ;;  %377 = vmatpush.msra.mxu1 %v1454_v10  ;;  %v337_v21 = vrot.slane %v336_v18, 1  ;;  %v441_v54 = vld [vmem:[#allocation6 + $0xc0] sm:$0xff]  ;;  %v440_v57 = vld [vmem:[#allocation6 + $0xb8] sm:$0xff]  ;;  %v439_v60 = vld [vmem:[#allocation6 + $0xb0] sm:$0xff] }
  0x45   : > { %474 = vmatpush.msra.mxu3 %v427_v49  ;;  %516 = vmatpush.msra.mxu0 %v511_v50  ;;  %v423_v61 = vld [vmem:[#allocation6 + $0x48] sm:$0xff]  ;;  %v422_v7 = vld [vmem:[#allocation6 + $0x40] sm:$0xff]  ;;  %v421_v15 = vld [vmem:[#allocation6 + $0x38] sm:$0xff] }
  0x46   : > { %346 = vmatpush.msra.mxu2 %v1458_v11  ;;  %378 = vmatpush.msra.mxu1 %v1458_v11  ;;  %v338_v24 = vadd.f32 %v337_v21, %v336_v18  ;;  %v507_v62 = vld [vmem:[#allocation6 + $0x148] sm:$0xff]  ;;  %v506_v9 = vld [vmem:[#allocation6 + $0x140] sm:$0xff]  ;;  %v505_v18 = vld [vmem:[#allocation6 + $0x138] sm:$0xff] }
  0x47   : > { %475 = vmatpush.msra.mxu3 %v426_v52  ;;  %517 = vmatpush.msra.mxu0 %v510_v53  ;;  %v438_v63 = vld [vmem:[#allocation6 + $0xa8] sm:$0xff]  ;;  %v437_v12 = vld [vmem:[#allocation6 + $0xa0] sm:$0xff]  ;;  %v436_v21 = vld [vmem:[#allocation6 + $0x98] sm:$0xff] }
  0x48   : > { %347 = vmatpush.msra.mxu2 %v1462_v13  ;;  %379 = vmatpush.msra.mxu1 %v1462_v13  ;;  %v504_v25 = vld [vmem:[#allocation6 + $0x130] sm:$0xff]  ;;  %v414_v43 = vld [vmem:[#allocation6] sm:$0xff] }
  0x49   : > { %476 = vmatpush.msra.mxu3 %v425_v55  ;;  %518 = vmatpush.msra.mxu0 %v509_v56  ;;  %v498_v44 = vld [vmem:[#allocation6 + $0x100] sm:$0xff] }
  0x4a   : > { %348 = vmatpush.msra.mxu2 %v1466_v14  ;;  %380 = vmatpush.msra.mxu1 %v1466_v14  ;;  %v1011_v49 = vld [vmem:[#allocation11 + $0x1] ss:$0 sm:$0xff] }
  0x4b   : > { %477 = vmatpush.msra.mxu3 %v424_v58  ;;  %519 = vmatpush.msra.mxu0 %v508_v59 }
  0x4c   : > { %349 = vmatpush.msra.mxu2 %v1470_v16  ;;  %381 = vmatpush.msra.mxu1 %v1470_v16 }
  0x4d   : > { %478 = vmatpush.msra.mxu3 %v423_v61  ;;  %520 = vmatpush.msra.mxu0 %v507_v62 }
  0x4e   : > { %350 = vmatpush.msra.mxu2 %v1474_v17  ;;  %382 = vmatpush.msra.mxu1 %v1474_v17 }
  0x4f   : > { %479 = vmatpush.msra.mxu3 %v422_v7  ;;  %521 = vmatpush.msra.mxu0 %v506_v9  ;;  %v638_v9 = vld [vmem:[#allocation8 + $0x78] sm:$0xff] }
  0x50   : > { %351 = vmatpush.msra.mxu2 %v1478_v19  ;;  %383 = vmatpush.msra.mxu1 %v1478_v19 }
  0x51   : > { %480 = vmatpush.msra.mxu3 %v421_v15  ;;  %522 = vmatpush.msra.mxu0 %v505_v18  ;;  %v636_v15 = vld [vmem:[#allocation8 + $0x68] sm:$0xff]  ;;  %v635_v18 = vld [vmem:[#allocation8 + $0x60] sm:$0xff] }
  0x52   : > { %352 = vmatpush.msra.mxu2 %v1482_v20  ;;  %384 = vmatpush.msra.mxu1 %v1482_v20 }
  0x53   : > { %523 = vmatpush.msra.mxu0 %v504_v25 }
  0x54   : > { %353 = vmatpush.msra.mxu2 %v1486_v22  ;;  %385 = vmatpush.msra.mxu1 %v1486_v22 }
  0x56   : > { %354 = vmatpush.msra.mxu2 %v1490_v23  ;;  %386 = vmatpush.msra.mxu1 %v1490_v23 }
  0x57   : > { %355 = vmatmul.f32.vlgmr.msra.gmra.mxu2 %v338_v24  ;;  %v420_v24 = vld [vmem:[#allocation6 + $0x30] sm:$0xff] }
  0x58   : > { %548 = vmatpush.msrb.mxu1 %v1426_v0  ;;  %449 = vmatpush.msrb.mxu2 %v448_v39 }
  0x59   : > { %481 = vmatpush.msra.mxu3 %v420_v24 }
  0x5a   : > { %549 = vmatpush.msrb.mxu1 %v1428_v1  ;;  %450 = vmatpush.msrb.mxu2 %v447_v40  ;;  %v500_v40 = vld [vmem:[#allocation6 + $0x110] sm:$0xff] }
  0x5c   : > { %550 = vmatpush.msrb.mxu1 %v1432_v2  ;;  %451 = vmatpush.msrb.mxu2 %v446_v41  ;;  %v415_v41 = vld [vmem:[#allocation6 + $0x8] sm:$0xff] }
  0x5e   : > { %551 = vmatpush.msrb.mxu1 %v1436_v3  ;;  %452 = vmatpush.msrb.mxu2 %v445_v42  ;;  %v499_v42 = vld [vmem:[#allocation6 + $0x108] sm:$0xff] }
  0x60   : > { %552 = vmatpush.msrb.mxu1 %v1444_v6  ;;  %453 = vmatpush.msrb.mxu2 %v444_v45 }
  0x62   : > { %553 = vmatpush.msrb.mxu1 %v1450_v8  ;;  %454 = vmatpush.msrb.mxu2 %v443_v48 }
  0x64   : > { %554 = vmatpush.msrb.mxu1 %v1454_v10  ;;  %455 = vmatpush.msrb.mxu2 %v442_v51 }
  0x66   : > { %555 = vmatpush.msrb.mxu1 %v1458_v11  ;;  %456 = vmatpush.msrb.mxu2 %v441_v54 }
  0x68   : > { %556 = vmatpush.msrb.mxu1 %v1462_v13  ;;  %457 = vmatpush.msrb.mxu2 %v440_v57 }
  0x6a   : > { %557 = vmatpush.msrb.mxu1 %v1466_v14  ;;  %458 = vmatpush.msrb.mxu2 %v439_v60 }
  0x6c   : > { %558 = vmatpush.msrb.mxu1 %v1470_v16  ;;  %459 = vmatpush.msrb.mxu2 %v438_v63 }
  0x6e   : > { %559 = vmatpush.msrb.mxu1 %v1474_v17  ;;  %460 = vmatpush.msrb.mxu2 %v437_v12  ;;  %v637_v12 = vld [vmem:[#allocation8 + $0x70] sm:$0xff] }
  0x70   : > { %560 = vmatpush.msrb.mxu1 %v1478_v19  ;;  %461 = vmatpush.msrb.mxu2 %v436_v21 }
  0x72   : > { %561 = vmatpush.msrb.mxu1 %v1482_v20 }
  0x74   : > { %562 = vmatpush.msrb.mxu1 %v1486_v22 }
  0x76   : > { %563 = vmatpush.msrb.mxu1 %v1490_v23 }
  0xda   : > { %v356_v26 = vpop.f32.mrf.mxu2 }
  0xdb   : > { %v359_v27 = vperm.slane %v356_v26, 0  ;;  %v435_v26 = vld [vmem:[#allocation6 + $0x90] sm:$0xff] }
  0xdc   : > { %462 = vmatpush.msrb.mxu2 %v435_v26 }
  0xdd   : > { %v1513_v28 = vsub.f32 %v1439_v4, %v359_v27  ;;  %v1516_v29 = vsub.f32 %v1441_v5, %v359_v27  ;;  %v419_v27 = vld [vmem:[#allocation6 + $0x28] sm:$0xff] }
  0xde   : > { %482 = vmatpush.msra.mxu3 %v419_v27 }
  0xdf   : > { %v362_v30 = vmul.f32 %v1513_v28, %v1513_v28  ;;  %v363_v31 = vmul.f32 %v1516_v29, %v1516_v29 }
  0xe1   : > { %v364_v32 = vadd.f32 %v363_v31, %v362_v30  ;;  %v503_v30 = vld [vmem:[#allocation6 + $0x128] sm:$0xff] }
  0xe2   : > { %v434_v31 = vld [vmem:[#allocation6 + $0x88] sm:$0xff]  ;;  %524 = vmatpush.msra.mxu0 %v503_v30 }
  0xe3   : > { %v365_v33 = vrot.slane %v364_v32, 4  ;;  %463 = vmatpush.msrb.mxu2 %v434_v31 }
  0xe5   : > { %v366_v34 = vadd.f32 %v365_v33, %v364_v32  ;;  %v418_v32 = vld [vmem:[#allocation6 + $0x20] sm:$0xff] }
  0xe6   : > { %v502_v33 = vld [vmem:[#allocation6 + $0x120] sm:$0xff]  ;;  %483 = vmatpush.msra.mxu3 %v418_v32 }
  0xe7   : > { %v367_v35 = vrot.slane %v366_v34, 2  ;;  %525 = vmatpush.msra.mxu0 %v502_v33 }
  0xe9   : > { %v368_v36 = vadd.f32 %v367_v35, %v366_v34  ;;  %v433_v34 = vld [vmem:[#allocation6 + $0x80] sm:$0xff] }
  0xea   : > { %464 = vmatpush.msrb.mxu2 %v433_v34 }
  0xeb   : > { %v369_v37 = vrot.slane %v368_v36, 1 }
  0xec   : > { %580 = vmatpush.msra.mxu2 %v1426_v0 }
  0xed   : > { %v370_v38 = vadd.f32 %v369_v37, %v368_v36  ;;  %v417_v36 = vld [vmem:[#allocation6 + $0x18] sm:$0xff] }
  0xee   : > { %v501_v37 = vld [vmem:[#allocation6 + $0x118] sm:$0xff]  ;;  %484 = vmatpush.msra.mxu3 %v417_v36  ;;  %581 = vmatpush.msra.mxu2 %v1428_v1  ;;  %v330_v1 = vld [vmem:[#allocation11] sm:$0x1] }
  0xef   : > { %387 = vmatmul.f32.vlgmr.msra.gmra.mxu1 %v370_v38  ;;  %v416_v38 = vld [vmem:[#allocation6 + $0x10] sm:$0xff]  ;;  %526 = vmatpush.msra.mxu0 %v501_v37 }
  0xf0   : > { %485 = vmatpush.msra.mxu3 %v416_v38  ;;  %582 = vmatpush.msra.mxu2 %v1432_v2  ;;  %v657_v38 = vld [vmem:[#allocation8 + $0xf8] sm:$0xff] }
  0xf1   : > { %527 = vmatpush.msra.mxu0 %v500_v40  ;;  %v656_v40 = vld [vmem:[#allocation8 + $0xf0] sm:$0xff] }
  0xf2   : > { %486 = vmatpush.msra.mxu3 %v415_v41  ;;  %583 = vmatpush.msra.mxu2 %v1436_v3  ;;  %v633_v41 = vld [vmem:[#allocation8 + $0x50] sm:$0xff] }
  0xf3   : > { %528 = vmatpush.msra.mxu0 %v499_v42  ;;  %v655_v42 = vld [vmem:[#allocation8 + $0xe8] sm:$0xff] }
  0xf4   : > { %487 = vmatpush.msra.mxu3 %v414_v43  ;;  %584 = vmatpush.msra.mxu2 %v1444_v6  ;;  %v632_v43 = vld [vmem:[#allocation8 + $0x48] sm:$0xff] }
  0xf5   : > { %529 = vmatpush.msra.mxu0 %v498_v44  ;;  %v654_v44 = vld [vmem:[#allocation8 + $0xe0] sm:$0xff] }
  0xf6   : > { %585 = vmatpush.msra.mxu2 %v1450_v8  ;;  %658 = vmatpush.msrb.mxu3 %v657_v38 }
  0xf7   : > { %681 = vmatpush.msrb.mxu0 %v638_v9  ;;  %v707_v9 = vld [vmem:[#allocation8 + $0x100] sm:$0xff] }
  0xf8   : > { %586 = vmatpush.msra.mxu2 %v1454_v10  ;;  %659 = vmatpush.msrb.mxu3 %v656_v40 }
  0xf9   : > { %682 = vmatpush.msrb.mxu0 %v637_v12 }
  0xfa   : > { %587 = vmatpush.msra.mxu2 %v1458_v11  ;;  %660 = vmatpush.msrb.mxu3 %v655_v42 }
  0xfb   : > { %683 = vmatpush.msrb.mxu0 %v636_v15 }
  0xfc   : > { %588 = vmatpush.msra.mxu2 %v1462_v13  ;;  %661 = vmatpush.msrb.mxu3 %v654_v44 }
  0xfd   : > { %684 = vmatpush.msrb.mxu0 %v635_v18 }
  0xfe   : > { %589 = vmatpush.msra.mxu2 %v1466_v14 }
 0x100   : > { %590 = vmatpush.msra.mxu2 %v1470_v16 }
 0x102   : > { %591 = vmatpush.msra.mxu2 %v1474_v17 }
 0x104   : > { %592 = vmatpush.msra.mxu2 %v1478_v19 }
 0x106   : > { %593 = vmatpush.msra.mxu2 %v1482_v20 }
 0x108   : > { %594 = vmatpush.msra.mxu2 %v1486_v22 }
 0x10a   : > { %595 = vmatpush.msra.mxu2 %v1490_v23 }
 0x16c   : > { %v388_v35 = vpop.f32.mrf.mxu1 }
 0x16d   : > { %v389_v39 = vadd.f32 1e-05, %v388_v35 }
 0x16f   : > { %1013 = vrsqrt.f32 %v389_v39  ;;  %vm397_vm1 = vweird.f32 %v389_v39 }
 0x175   : > { %v1014_v45 = vpop.eup %1013 }
 0x176   : > { %v392_v46 = vmul.f32 %v1014_v45, %v389_v39  ;;  %vm398_vm0 = vweird.f32 %v1014_v45  ;;  %v634_v39 = vld [vmem:[#allocation8 + $0x58] sm:$0xff] }
 0x177   : > { %vm399_vm2 = vmor %vm397_vm1, %vm398_vm0  ;;  %685 = vmatpush.msrb.mxu0 %v634_v39 }
 0x178   : > { %v393_v0 = vmul.f32 %v1014_v45, %v392_v46  ;;  %v722_v46 = vld [vmem:[#allocation8 + $0x178] sm:$0xff] }
 0x179   : > { %686 = vmatpush.msrb.mxu0 %v633_v41  ;;  %903 = vmatpush.msra.mxu1 %v722_v46 }
 0x17a   : > { %v394_v47 = vmul.f32 0.5, %v393_v0  ;;  %v653_v0 = vld [vmem:[#allocation8 + $0xd8] sm:$0xff] }
 0x17b   : > { %687 = vmatpush.msrb.mxu0 %v632_v43  ;;  %662 = vmatpush.msrb.mxu3 %v653_v0 }
 0x17c   : > { %v395_v48 = vsub.f32 1.5, %v394_v47  ;;  %v630_v47 = vld [vmem:[#allocation8 + $0x38] sm:$0xff] }
 0x17e   : > { %v396_v2 = vmul.f32 %v1014_v45, %v395_v48  ;;  %v721_v48 = vld [vmem:[#allocation8 + $0x170] sm:$0xff] }
 0x17f   : > { %904 = vmatpush.msra.mxu1 %v721_v48 }
 0x180   : > { %v400_v3 = vsel %vm399_vm2, %v1014_v45, %v396_v2  ;;  %v631_v45 = vld [vmem:[#allocation8 + $0x40] sm:$0xff]  ;;  %v629_v2 = vld [vmem:[#allocation8 + $0x30] sm:$0xff] }
 0x181   : > { %v401_v6 = vmul.f32 %v400_v3, %v330_v1  ;;  %688 = vmatpush.msrb.mxu0 %v631_v45  ;;  %v652_v1 = vld [vmem:[#allocation8 + $0xd0] sm:$0xff]  ;;  %v720_v3 = vld [vmem:[#allocation8 + $0x168] sm:$0xff] }
 0x182   : > { %663 = vmatpush.msrb.mxu3 %v652_v1  ;;  %905 = vmatpush.msra.mxu1 %v720_v3 }
 0x183   : > { %v402_v8 = vperm.slane %v401_v6, 0  ;;  %689 = vmatpush.msrb.mxu0 %v630_v47  ;;  %v651_v6 = vld [vmem:[#allocation8 + $0xc8] sm:$0xff] }
 0x184   : > { %664 = vmatpush.msrb.mxu3 %v651_v6 }
 0x185   : > { %v403_v10 = vmul.f32 %v402_v8, %v1513_v28  ;;  %v404_v11 = vmul.f32 %v402_v8, %v1516_v29  ;;  %690 = vmatpush.msrb.mxu0 %v629_v2  ;;  %v628_v8 = vld [vmem:[#allocation8 + $0x28] sm:$0xff] }
 0x187   : > { %v406_v50 = vadd.f32 %v1011_v49, %v403_v10  ;;  %v407_v51 = vadd.f32 %v1011_v49, %v404_v11  ;;  %691 = vmatpush.msrb.mxu0 %v628_v8  ;;  %v719_v49 = vld [vmem:[#allocation8 + $0x160] sm:$0xff] }
 0x188   : > { %v650_v10 = vld [vmem:[#allocation8 + $0xc0] sm:$0xff]  ;;  %906 = vmatpush.msra.mxu1 %v719_v49 }
 0x189   : > { %v408_v13 = vmax.f32 %v406_v50, 0.0  ;;  %v409_v52 = vmax.f32 %v407_v51, 0.0  ;;  %v627_v11 = vld [vmem:[#allocation8 + $0x20] sm:$0xff]  ;;  %665 = vmatpush.msrb.mxu3 %v650_v10  ;;  %v718_v50 = vld [vmem:[#allocation8 + $0x158] sm:$0xff] }
 0x18a   : > { %692 = vmatpush.msrb.mxu0 %v627_v11  ;;  %v649_v51 = vld [vmem:[#allocation8 + $0xb8] sm:$0xff]  ;;  %907 = vmatpush.msra.mxu1 %v718_v50 }
 0x18b   : > { %410 = vst [vmem:[#allocation2 + $0x1] sm:$0xff] %v408_v13  ;;  %465 = vmatmul.f32.vlgmr.msrb.gmra.mxu2 %v408_v13  ;;  %v626_v13 = vld [vmem:[#allocation8 + $0x18] sm:$0xff]  ;;  %666 = vmatpush.msrb.mxu3 %v649_v51 }
 0x18c   : > { %411 = vst [vmem:[#allocation2 + $0x9] sm:$0xff] %v409_v52  ;;  %693 = vmatpush.msrb.mxu0 %v626_v13 }
 0x192   : > { %v412_v14 = vld [vmem:[#allocation2] sm:$0xff] }
 0x193   : > { %488 = vmatmul.f32.vlgmr.msra.gmra.mxu3 %v412_v14  ;;  %v495_v16 = vld [vmem:[#allocation2 + $0x2] sm:$0xff]  ;;  %468 = vmatmul.f32.gmra.mxu2 %v409_v52  ;;  %v496_v19 = vld [vmem:[#allocation2 + $0xa] sm:$0xff] }
 0x194   : > { %530 = vmatmul.f32.vlgmr.msra.gmra.mxu0 %v495_v16  ;;  %v413_v17 = vld [vmem:[#allocation2 + $0x8] sm:$0xff] }
 0x195   : > { %v717_v52 = vld [vmem:[#allocation8 + $0x150] sm:$0xff] }
 0x196   : > { %v648_v14 = vld [vmem:[#allocation8 + $0xb0] sm:$0xff]  ;;  %908 = vmatpush.msra.mxu1 %v717_v52 }
 0x197   : > { %v625_v16 = vld [vmem:[#allocation8 + $0x10] sm:$0xff]  ;;  %667 = vmatpush.msrb.mxu3 %v648_v14 }
 0x198   : > { %694 = vmatpush.msrb.mxu0 %v625_v16 }
 0x19b   : > { %491 = vmatmul.f32.gmra.mxu3 %v413_v17  ;;  %v716_v17 = vld [vmem:[#allocation8 + $0x148] sm:$0xff] }
 0x19c   : > { %533 = vmatmul.f32.gmra.mxu0 %v496_v19  ;;  %v647_v19 = vld [vmem:[#allocation8 + $0xa8] sm:$0xff]  ;;  %909 = vmatpush.msra.mxu1 %v716_v17 }
 0x19d   : > { %668 = vmatpush.msrb.mxu3 %v647_v19 }
 0x20e   : > { %v466_v28 = vpop.f32.mrf.mxu2 }
 0x211   : > { %v531_v20 = vpop.f32.mrf.mxu0 }
 0x216   : > { %v489_v29 = vpop.f32.mrf.mxu3  ;;  %v469_v54 = vpop.f32.mrf.mxu2 }
 0x217   : > { %v490_v53 = vadd.f32 %v489_v29, %v466_v28  ;;  %v624_v28 = vld [vmem:[#allocation8 + $0x8] sm:$0xff]  ;;  %v646_v29 = vld [vmem:[#allocation8 + $0xa0] sm:$0xff] }
 0x218   : > { %695 = vmatpush.msrb.mxu0 %v624_v28  ;;  %669 = vmatpush.msrb.mxu3 %v646_v29 }
 0x219   : > { %v534_v56 = vpop.f32.mrf.mxu0  ;;  %v537_v57 = vadd.f32 %v531_v20, %v490_v53  ;;  %v715_v20 = vld [vmem:[#allocation8 + $0x140] sm:$0xff] }
 0x21a   : > { %910 = vmatpush.msra.mxu1 %v715_v20  ;;  %v623_v53 = vld [vmem:[#allocation8] sm:$0xff] }
 0x21b   : > { %696 = vmatpush.msrb.mxu0 %v623_v53 }
 0x21d   : > { %723 = vmatpush.msra.mxu0 %v722_v46 }
 0x21e   : > { %v492_v22 = vpop.f32.mrf.mxu3 }
 0x21f   : > { %v493_v55 = vadd.f32 %v492_v22, %v469_v54  ;;  %v714_v54 = vld [vmem:[#allocation8 + $0x138] sm:$0xff]  ;;  %724 = vmatpush.msra.mxu0 %v721_v48 }
 0x220   : > { %v645_v22 = vld [vmem:[#allocation8 + $0x98] sm:$0xff]  ;;  %911 = vmatpush.msra.mxu1 %v714_v54 }
 0x221   : > { %v538_v58 = vadd.f32 %v534_v56, %v493_v55  ;;  %v713_v55 = vld [vmem:[#allocation8 + $0x130] sm:$0xff]  ;;  %670 = vmatpush.msrb.mxu3 %v645_v22  ;;  %725 = vmatpush.msra.mxu0 %v720_v3 }
 0x222   : > { %v644_v56 = vld [vmem:[#allocation8 + $0x90] sm:$0xff]  ;;  %912 = vmatpush.msra.mxu1 %v713_v55 }
 0x223   : > { %v541_v23 = vadd.f32 %v538_v58, %v537_v57  ;;  %671 = vmatpush.msrb.mxu3 %v644_v56  ;;  %726 = vmatpush.msra.mxu0 %v719_v49 }
 0x225   : > { %v542_v59 = vrot.slane %v541_v23, 4  ;;  %727 = vmatpush.msra.mxu0 %v718_v50 }
 0x227   : > { %v543_v60 = vadd.f32 %v542_v59, %v541_v23  ;;  %v711_v23 = vld [vmem:[#allocation8 + $0x120] sm:$0xff]  ;;  %728 = vmatpush.msra.mxu0 %v717_v52 }
 0x228   : > { %v642_v59 = vld [vmem:[#allocation8 + $0x80] sm:$0xff] }
 0x229   : > { %v544_v61 = vrot.slane %v543_v60, 2  ;;  %729 = vmatpush.msra.mxu0 %v716_v17 }
 0x22b   : > { %v545_v62 = vadd.f32 %v544_v61, %v543_v60  ;;  %v710_v61 = vld [vmem:[#allocation8 + $0x118] sm:$0xff]  ;;  %730 = vmatpush.msra.mxu0 %v715_v20 }
 0x22d   : > { %v546_v63 = vrot.slane %v545_v62, 1  ;;  %731 = vmatpush.msra.mxu0 %v714_v54 }
 0x22f   : > { %v547_v7 = vadd.f32 %v546_v63, %v545_v62  ;;  %v709_v62 = vld [vmem:[#allocation8 + $0x110] sm:$0xff]  ;;  %732 = vmatpush.msra.mxu0 %v713_v55 }
 0x231   : > { %564 = vmatmul.f32.vlgmr.msrb.gmra.mxu1 %v547_v7  ;;  %v708_v7 = vld [vmem:[#allocation8 + $0x108] sm:$0xff] }
 0x2ae   : > { %v565_v21 = vpop.f32.mrf.mxu1 }
 0x2af   : > { %v568_v24 = vperm.slane %v565_v21, 0 }
 0x2b1   : > { %v1540_v25 = vsub.f32 %v537_v57, %v568_v24  ;;  %v1542_v26 = vsub.f32 %v538_v58, %v568_v24  ;;  %v712_v57 = vld [vmem:[#allocation8 + $0x128] sm:$0xff] }
 0x2b2   : > { %v643_v58 = vld [vmem:[#allocation8 + $0x88] sm:$0xff]  ;;  %913 = vmatpush.msra.mxu1 %v712_v57  ;;  %733 = vmatpush.msra.mxu0 %v712_v57 }
 0x2b3   : > { %v571_v27 = vmul.f32 %v1540_v25, %v1540_v25  ;;  %v572_v30 = vmul.f32 %v1542_v26, %v1542_v26  ;;  %672 = vmatpush.msrb.mxu3 %v643_v58 }
 0x2b4   : > { %914 = vmatpush.msra.mxu1 %v711_v23  ;;  %734 = vmatpush.msra.mxu0 %v711_v23 }
 0x2b5   : > { %v573_v31 = vadd.f32 %v572_v30, %v571_v27  ;;  %673 = vmatpush.msrb.mxu3 %v642_v59  ;;  %v539_v27 = vld [vmem:[#allocation11 + $0x2] sm:$0x1] }
 0x2b6   : > { %915 = vmatpush.msra.mxu1 %v710_v61  ;;  %735 = vmatpush.msra.mxu0 %v710_v61 }
 0x2b7   : > { %v574_v32 = vrot.slane %v573_v31, 4 }
 0x2b8   : > { %916 = vmatpush.msra.mxu1 %v709_v62  ;;  %736 = vmatpush.msra.mxu0 %v709_v62 }
 0x2b9   : > { %v575_v33 = vadd.f32 %v574_v32, %v573_v31 }
 0x2ba   : > { %917 = vmatpush.msra.mxu1 %v708_v7  ;;  %737 = vmatpush.msra.mxu0 %v708_v7 }
 0x2bb   : > { %v576_v34 = vrot.slane %v575_v33, 2 }
 0x2bc   : > { %918 = vmatpush.msra.mxu1 %v707_v9  ;;  %738 = vmatpush.msra.mxu0 %v707_v9 }
 0x2bd   : > { %v577_v35 = vadd.f32 %v576_v34, %v575_v33  ;;  %v1012_v34 = vld [vmem:[#allocation11 + $0x3] ss:$0 sm:$0xff] }
 0x2bf   : > { %v578_v36 = vrot.slane %v577_v35, 1 }
 0x2c1   : > { %v579_v37 = vadd.f32 %v578_v36, %v577_v35 }
 0x2c3   : > { %596 = vmatmul.f32.vlgmr.msra.gmra.mxu2 %v579_v37 }
 0x346   : > { %v597_v60 = vpop.f32.mrf.mxu2 }
 0x347   : > { %v598_v63 = vadd.f32 1e-05, %v597_v60 }
 0x349   : > { %1015 = vrsqrt.f32 %v598_v63  ;;  %vm606_vm4 = vweird.f32 %v598_v63 }
 0x34f   : > { %v1016_v12 = vpop.eup %1015 }
 0x350   : > { %v601_v15 = vmul.f32 %v1016_v12, %v598_v63  ;;  %vm607_vm3 = vweird.f32 %v1016_v12 }
 0x351   : > { %vm608_vm5 = vmor %vm606_vm4, %vm607_vm3 }
 0x352   : > { %v602_v18 = vmul.f32 %v1016_v12, %v601_v15 }
 0x354   : > { %v603_v21 = vmul.f32 0.5, %v602_v18 }
 0x356   : > { %v604_v24 = vsub.f32 1.5, %v603_v21 }
 0x358   : > { %v605_v30 = vmul.f32 %v1016_v12, %v604_v24 }
 0x35a   : > { %v609_v31 = vsel %vm608_vm5, %v1016_v12, %v605_v30 }
 0x35b   : > { %v610_v32 = vmul.f32 %v609_v31, %v539_v27 }
 0x35d   : > { %v611_v33 = vperm.slane %v610_v32, 0 }
 0x35f   : > { %v612_v35 = vmul.f32 %v611_v33, %v1540_v25  ;;  %v613_v36 = vmul.f32 %v611_v33, %v1542_v26 }
 0x361   : > { %v615_v37 = vadd.f32 %v1012_v34, %v612_v35  ;;  %v616_v38 = vadd.f32 %v1012_v34, %v613_v36 }
 0x363   : > { %v617_v39 = vmax.f32 %v615_v37, 0.0  ;;  %v618_v40 = vmax.f32 %v616_v38, 0.0 }
 0x365   : > { %619 = vst [vmem:[#allocation2 + $0x1] sm:$0xff] %v617_v39  ;;  %674 = vmatmul.f32.vlgmr.msrb.gmra.mxu3 %v617_v39 }
 0x366   : > { %620 = vst [vmem:[#allocation2 + $0x9] sm:$0xff] %v618_v40 }
 0x36c   : > { %v621_v41 = vld [vmem:[#allocation2] sm:$0xff] }
 0x36d   : > { %697 = vmatmul.f32.vlgmr.msrb.gmra.mxu0 %v621_v41  ;;  %v705_v42 = vld [vmem:[#allocation2 + $0xa] sm:$0xff]  ;;  %677 = vmatmul.f32.gmra.mxu3 %v618_v40  ;;  %v704_v44 = vld [vmem:[#allocation2 + $0x2] sm:$0xff] }
 0x36e   : > { %742 = vmatmul.f32.vlgmr.msra.gmra.mxu1 %v705_v42  ;;  %v622_v43 = vld [vmem:[#allocation2 + $0x8] sm:$0xff] }
 0x375   : > { %700 = vmatmul.f32.gmra.mxu0 %v622_v43 }
 0x37d   : > { %739 = vmatmul.f32.vlgmr.msra.gmra.mxu0 %v704_v44 }
 0x3e8   : > { %v675_v25 = vpop.f32.mrf.mxu3 }
 0x3ea   : > { %v698_v26 = vpop.f32.mrf.mxu0 }
 0x3eb   : > { %v743_v47 = vpop.f32.mrf.mxu1  ;;  %v699_v2 = vadd.f32 %v698_v26, %v675_v25 }
 0x3f0   : > { %v678_v46 = vpop.f32.mrf.mxu3 }
 0x3f2   : > { %v701_v45 = vpop.f32.mrf.mxu0 }
 0x3f3   : > { %v702_v0 = vadd.f32 %v701_v45, %v678_v46 }
 0x3f5   : > { %v747_v48 = vadd.f32 %v743_v47, %v702_v0 }
 0x3f7   : > { %v749_v1 = vadd.f32 %v747_v48, %v1441_v5 }
 0x3f9   : > { %751 = vst [vmem:[%s308_s6 + $0x8] sm:$0xff] %v749_v1 }
 0x3fa   : > { %v740_v3 = vpop.f32.mrf.mxu0 }
 0x3fb   : > { %v746_v6 = vadd.f32 %v740_v3, %v699_v2 }
 0x3fd   : > { %v748_v8 = vadd.f32 %v746_v6, %v1439_v4 }
 0x3ff   : > { %750 = vst [vmem:[%s308_s6] sm:$0xff] %v748_v8 }
 0x400   : > { %1194 = shalt.err (!%p1191_p10)
}
 0x401   : > { %s1250_s28 = smov 128   ;;  %s1251_s17 = smov 8  }
 0x402   : > { %937 = dma.vmem_to_hbm [thread:$0]  (%p1375_p3), %s766_s8, 256, %s768_s10, %s753_s22, %s1250_s28, %s1250_s28, %s1251_s17  }
 0x403 PF: > { %s782_s24 = sand.u32 1, %s1229_s18   ;;  %p1601_p12 = scmp.ge.s32.totalorder %s1241_s21, 2 }
 0x404   : > { %s783_s29 = scalar_lea.sflag [#allocation5], %s782_s24 }
 0x405   : > { %p957_p13 = pnand %p1601_p12, %p1317_p6 }
 0x407   : > { %p958_p0 = pneg %p957_p13 }
 0x409   : > { %1224 = dma.done.wait (%p958_p0), %s783_s29, 256  }
 0x40a   : > { %1226 = vsyncadd (%p958_p0), %s783_s29, 4294967040  ;;  %p20_p5 = scmp.ge.s32.totalorder %s1365_s9, 4   ;;  %s1602_s18 = smov %s1233_s19 }
 0x40b   : > { %s1603_s19 = smov %s1237_s20  ;;  %s1604_s20 = smov %s1381_s15 }
 0x40c   : > { %s1605_s21 = smov %s1365_s9  ;;  %22 = sbr.rel (!%p20_p5) target bundleno = 7 (0x7), region = 105 }
 0x411   :  { %789 = vsyncpa [#allocation4], 1 }
 0x412   :  { %791 = vsyncpa [#allocation4 + $0x1], 1 }
 0x413   :  { %792 = vsyncpa [#allocation7], 1 }
 0x414   :  { %793 = vsyncpa [#allocation10], 1 }
 0x415   :  { %794 = vsyncpa [#allocation5], 1 }
 0x416   :  { %796 = vsyncpa [#allocation5 + $0x1], 1 }

</bundles_post_ra>
